<compile_context>
chip_gen: v7x
topology: tpu7x:2x2x1
jax: 0.10.0
libtpu: 0.0.40
codegen_flags: <defaults>
</compile_context>

<pallas_src>
import functools

import jax
import jax.numpy as jnp
from jax.experimental import pallas as pl
from jax.experimental.pallas import tpu as pltpu


def _round_up(x, m):
    return ((x + m - 1) // m) * m


# ----------------------------------------------------------------------------
# Kernel: fused 4-layer MLP forward over one batch tile
# ----------------------------------------------------------------------------
def deepnn_kernel(x_ref, p_ref, out_ref, *, d_pad, hidden):
    """x_ref: (tile_b, d_pad) f32, p_ref: packed params (d_pad + 2*H + 8, H),
    out_ref: (tile_b, 1) f32."""
    x = x_ref[...]                                              # (tb, d_pad)

    # Static, 8-row-aligned slices of the single packed parameter buffer.
    w1 = p_ref[0:d_pad, :]                                      # (d_pad, H)
    w2 = p_ref[d_pad:d_pad + hidden, :]                         # (H, H)
    w3 = p_ref[d_pad + hidden:d_pad + 2 * hidden, :]            # (H, H)
    misc = p_ref[d_pad + 2 * hidden:d_pad + 2 * hidden + 8, :]  # (8, H)

    b1 = misc[0:1, :]                                           # (1, H)
    b2 = misc[1:2, :]
    b3 = misc[2:3, :]
    w4_row = misc[3:4, :]                                       # (1, H)
    b4 = misc[4:5, 0:1]                                         # (1, 1)

    # Layers 1-3: MXU matmul (weights already (in, out)) + bias + ReLU.
    h = jnp.dot(x, w1, preferred_element_type=jnp.float32) + b1
    h = jnp.maximum(h, 0.0)
    h = jnp.dot(h, w2, preferred_element_type=jnp.float32) + b2
    h = jnp.maximum(h, 0.0)
    h = jnp.dot(h, w3, preferred_element_type=jnp.float32) + b3
    h = jnp.maximum(h, 0.0)

    # Layer 4 (H -> 1): VPU multiply + row reduction instead of an N=1 MXU
    # matmul; avoids an MXU push/pop round-trip for a single output lane.
    y = jnp.sum(h * w4_row, axis=-1, keepdims=True) + b4        # (tb, 1)

    out_ref[...] = y.astype(out_ref.dtype)


# ----------------------------------------------------------------------------
# Wrapper: pack params once, tile the batch, launch the fused kernel
# ----------------------------------------------------------------------------
def pack_params(params, input_dim, hidden=32):
    """Pack PyTorch-layout params into one (d_pad + 2*H + 8, H) f32 buffer:
       rows [0, d_pad)                : W1^T zero-padded on the input dim
       rows [d_pad, d_pad+H)          : W2^T
       rows [d_pad+H, d_pad+2H)       : W3^T
       rows [d_pad+2H, d_pad+2H+8)    : b1 | b2 | b3 | w4-row | b4 | pad
    """
    (w1, b1), (w2, b2), (w3, b3), (w4, b4) = params
    d_pad = max(8, _round_up(input_dim, 8))

    w1_t = jnp.zeros((d_pad, hidden), jnp.float32).at[:input_dim, :].set(w1.T)
    misc = jnp.zeros((8, hidden), jnp.float32)
    misc = misc.at[0, :].set(b1)
    misc = misc.at[1, :].set(b2)
    misc = misc.at[2, :].set(b3)
    misc = misc.at[3, :].set(w4[0, :])      # (1, H) PyTorch row of the last layer
    misc = misc.at[4, 0].set(b4[0])

    packed = jnp.concatenate([w1_t, w2.T, w3.T, misc], axis=0)
    return packed, d_pad


def deepnn_forward(x, params, hidden=32, tile_b=512):
    """x: (B, input_dim) f32.  params: list of (W, b), PyTorch layout
    W=(out, in), b=(out,).  Returns (B, 1) f32."""
    B, D = x.shape
    packed, d_pad = pack_params(params, D, hidden)
    n_rows = packed.shape[0]

    tb = min(tile_b, _round_up(B, 8))       # small demo batches stay small
    b_pad = _round_up(B, tb)

    # Pad batch to a tile multiple and features to d_pad (matching W1 zero rows).
    x_p = jnp.zeros((b_pad, d_pad), jnp.float32).at[:B, :D].set(x)

    kernel = functools.partial(deepnn_kernel, d_pad=d_pad, hidden=hidden)

    out = pl.pallas_call(
        kernel,
        out_shape=jax.ShapeDtypeStruct((b_pad, 1), jnp.float32),
        grid=(b_pad // tb,),
        in_specs=[
            # Batch tile of activations: streams through VMEM.
            pl.BlockSpec((tb, d_pad), lambda i: (i, 0)),
            # Packed params: one DMA, resident across all batch tiles.
            pl.BlockSpec((n_rows, hidden), lambda i: (0, 0)),
        ],
        out_specs=pl.BlockSpec((tb, 1), lambda i: (i, 0)),
        compiler_params=pltpu.CompilerParams(
            dimension_semantics=("parallel",)),  # shard batch tiles across TCs
    )(x_p, packed)

    return out[:B]


# ----------------------------------------------------------------------------
# Deterministic parameter init (PyTorch nn.Linear default: U(-k, k), k=1/sqrt(in))
# ----------------------------------------------------------------------------
def init_params(key, input_dim, hidden_dims=(32, 32, 32)):
    dims = [input_dim, *hidden_dims, 1]
    params = []
    for i in range(len(dims) - 1):
        in_d, out_d = dims[i], dims[i + 1]
        key, kw, kb = jax.random.split(key, 3)
        bound = 1.0 / jnp.sqrt(jnp.float32(in_d))
        w = jax.random.uniform(kw, (out_d, in_d), jnp.float32, -bound, bound)
        b = jax.random.uniform(kb, (out_d,), jnp.float32, -bound, bound)
        params.append((w, b))
    return params


def reference_forward(x, params):
    h = x
    for i, (w, b) in enumerate(params):
        h = h @ w.T + b
        if i < len(params) - 1:
            h = jnp.maximum(h, 0.0)
    return h


if __name__ == "__main__":
    SEQ_LEN = 12          # input_dim, as in the training script
    BATCH = 8

    key = jax.random.PRNGKey(0)
    key, kx, kx_big = jax.random.split(key, 3)
    params = init_params(key, SEQ_LEN)

    # Small batch (matches the training-script shape).
    x = jax.random.normal(kx, (BATCH, SEQ_LEN), jnp.float32)
    out = jax.block_until_ready(deepnn_forward(x, params))
    ref = reference_forward(x, params)
    assert out.shape == (BATCH, 1), out.shape
    assert jnp.allclose(out, ref, atol=1e-4, rtol=1e-4), (out, ref)

    # Larger batch to exercise the batch grid / tiling path.
    x_big = jax.random.normal(kx_big, (1000, SEQ_LEN), jnp.float32)
    out_big = jax.block_until_ready(deepnn_forward(x_big, params))
    ref_big = reference_forward(x_big, params)
    assert out_big.shape == (1000, 1), out_big.shape
    assert jnp.allclose(out_big, ref_big, atol=1e-4, rtol=1e-4)

    print("KERNEL_OK")
</pallas_src>

<mosaic_0001>
module attributes {stable_mosaic.version = 11 : i64} {
  func.func @deepnn_kernel(%arg0: i32, %arg1: memref<8x16xf32, #tpu.memory_space<vmem>>, %arg2: memref<88x32xf32, #tpu.memory_space<vmem>>, %arg3: memref<8x1xf32, #tpu.memory_space<vmem>>) attributes {dimension_semantics = [#tpu.dimension_semantics<parallel>], iteration_bounds = array<i64: 1>, scalar_prefetch = 0 : i64, scratch_operands = 0 : i64, tpu.core_type = #tpu.core_type<tc>, window_params = [{transform_indices = @transform_0, window_bounds = array<i64: 8, 16>}, {pipeline_mode = #tpu.pipeline_mode<synchronous>, transform_indices = @transform_1, window_bounds = array<i64: 88, 32>}, {transform_indices = @transform_2, window_bounds = array<i64: 8, 1>}]} {
    %c0 = arith.constant 0 : index
    %c0_0 = arith.constant 0 : index
    %0 = vector.load %arg1[%c0, %c0_0] : memref<8x16xf32, #tpu.memory_space<vmem>>, vector<8x16xf32>
    %c0_1 = arith.constant 0 : index
    %c0_2 = arith.constant 0 : index
    %1 = vector.load %arg2[%c0_1, %c0_2] : memref<88x32xf32, #tpu.memory_space<vmem>>, vector<16x32xf32>
    %c16 = arith.constant 16 : index
    %c0_3 = arith.constant 0 : index
    %2 = vector.load %arg2[%c16, %c0_3] : memref<88x32xf32, #tpu.memory_space<vmem>>, vector<32x32xf32>
    %c48 = arith.constant 48 : index
    %c0_4 = arith.constant 0 : index
    %3 = vector.load %arg2[%c48, %c0_4] : memref<88x32xf32, #tpu.memory_space<vmem>>, vector<32x32xf32>
    %c80 = arith.constant 80 : index
    %c0_5 = arith.constant 0 : index
    %4 = vector.load %arg2[%c80, %c0_5] : memref<88x32xf32, #tpu.memory_space<vmem>>, vector<8x32xf32>
    %5 = vector.extract_strided_slice %4 {offsets = [0, 0], sizes = [1, 32], strides = [1, 1]} : vector<8x32xf32> to vector<1x32xf32>
    %6 = vector.extract_strided_slice %4 {offsets = [1, 0], sizes = [1, 32], strides = [1, 1]} : vector<8x32xf32> to vector<1x32xf32>
    %7 = vector.extract_strided_slice %4 {offsets = [2, 0], sizes = [1, 32], strides = [1, 1]} : vector<8x32xf32> to vector<1x32xf32>
    %8 = vector.extract_strided_slice %4 {offsets = [3, 0], sizes = [1, 32], strides = [1, 1]} : vector<8x32xf32> to vector<1x32xf32>
    %9 = vector.extract_strided_slice %4 {offsets = [4, 0], sizes = [1, 1], strides = [1, 1]} : vector<8x32xf32> to vector<1x1xf32>
    %cst = arith.constant dense<0.000000e+00> : vector<8x32xf32>
    %10 = tpu.matmul %0, %1, %cst {dimension_numbers = #tpu.dot_dimension_numbers<[1], [0], [0], [1], [0, 0, 1, 1], [], []>} : vector<8x16xf32>, vector<16x32xf32>, vector<8x32xf32> -> vector<8x32xf32>
    %11 = vector.broadcast %5 : vector<1x32xf32> to vector<8x32xf32>
    %12 = arith.addf %10, %11 : vector<8x32xf32>
    %cst_6 = arith.constant 0.000000e+00 : f32
    %13 = vector.broadcast %cst_6 : f32 to vector<8x32xf32>
    %14 = arith.maximumf %12, %13 : vector<8x32xf32>
    %cst_7 = arith.constant dense<0.000000e+00> : vector<8x32xf32>
    %15 = tpu.matmul %14, %2, %cst_7 {dimension_numbers = #tpu.dot_dimension_numbers<[1], [0], [0], [1], [0, 0, 1, 1], [], []>} : vector<8x32xf32>, vector<32x32xf32>, vector<8x32xf32> -> vector<8x32xf32>
    %16 = vector.broadcast %6 : vector<1x32xf32> to vector<8x32xf32>
    %17 = arith.addf %15, %16 : vector<8x32xf32>
    %cst_8 = arith.constant 0.000000e+00 : f32
    %18 = vector.broadcast %cst_8 : f32 to vector<8x32xf32>
    %19 = arith.maximumf %17, %18 : vector<8x32xf32>
    %cst_9 = arith.constant dense<0.000000e+00> : vector<8x32xf32>
    %20 = tpu.matmul %19, %3, %cst_9 {dimension_numbers = #tpu.dot_dimension_numbers<[1], [0], [0], [1], [0, 0, 1, 1], [], []>} : vector<8x32xf32>, vector<32x32xf32>, vector<8x32xf32> -> vector<8x32xf32>
    %21 = vector.broadcast %7 : vector<1x32xf32> to vector<8x32xf32>
    %22 = arith.addf %20, %21 : vector<8x32xf32>
    %cst_10 = arith.constant 0.000000e+00 : f32
    %23 = vector.broadcast %cst_10 : f32 to vector<8x32xf32>
    %24 = arith.maximumf %22, %23 : vector<8x32xf32>
    %25 = vector.broadcast %8 : vector<1x32xf32> to vector<8x32xf32>
    %26 = arith.mulf %24, %25 : vector<8x32xf32>
    %cst_11 = arith.constant dense<0.000000e+00> : vector<8xf32>
    %27 = vector.multi_reduction <add>, %26, %cst_11 [1] : vector<8x32xf32> to vector<8xf32>
    %28 = vector.shape_cast %27 : vector<8xf32> to vector<8x1xf32>
    %29 = vector.broadcast %9 : vector<1x1xf32> to vector<8x1xf32>
    %30 = arith.addf %28, %29 : vector<8x1xf32>
    %c0_12 = arith.constant 0 : index
    %c0_13 = arith.constant 0 : index
    %31 = vector.load %arg3[%c0_12, %c0_13] : memref<8x1xf32, #tpu.memory_space<vmem>>, vector<8x1xf32>
    tpu.vector_store %arg3[%c0_12, %c0_13], %30 {strides = array<i32>} : memref<8x1xf32, #tpu.memory_space<vmem>>, vector<8x1xf32>,
    return
  }
  func.func @transform_0(%arg0: i32) -> (i32, i32) {
    %c0_i32 = arith.constant 0 : i32
    %c0_i32_0 = arith.constant 0 : i32
    return %arg0, %c0_i32 : i32, i32
  }
  func.func @transform_1(%arg0: i32) -> (i32, i32) {
    %c0_i32 = arith.constant 0 : i32
    %c0_i32_0 = arith.constant 0 : i32
    %c0_i32_1 = arith.constant 0 : i32
    return %c0_i32, %c0_i32_0 : i32, i32
  }
  func.func @transform_2(%arg0: i32) -> (i32, i32) {
    %c0_i32 = arith.constant 0 : i32
    %c0_i32_0 = arith.constant 0 : i32
    return %arg0, %c0_i32 : i32, i32
  }
}

</mosaic_0001>

<bundles_post_ra>
// kernel: tpu_custom_call.1
= control target key start
LH: loop header
LB: loop body
LE: loop exit
PB: predicated region body
PF: predicated region fallthrough
CT: control target
= control target key end

     0   :  { %v341_v0 = vmov 0.0|0.0   ;;  %vm342_vm0 = vmmov 0   ;;  %v343_v3 = vmov 0.0   ;;  %vm27_vm1 = vcmask 130048   ;;  %s404_s1 = inlined_call_operand.vmem [shape: f32[88,32], index: 1, kind: input, shape index: {}]   ;;  %s405_s0 = inlined_call_operand.vmem [shape: f32[8,16], index: 0, kind: input, shape index: {}]   ;;  %s406_s2 = inlined_call_operand.vmem [shape: f32[8,1], index: 2, kind: output, shape index: {}]  }
   0x1   :  { %323 = vmatprep.subr.bf16.mxu0 %v341_v0  ;;  %v12_v1 = vld [vmem:[%s404_s1] sm:$0xff]  ;;  %v13_v2 = vld [vmem:[%s404_s1 + $0x8] sm:$0xff]  ;;  %298 = vmatprep.mubr.msk.f32.mxu0 %vm342_vm0, %v343_v3  ;;  %v14_v5 = vld [vmem:[%s404_s1 + $0x10] sm:$0xff]  ;;  %v23_v15 = vlaneseq  ;;  %vm106_vm2 = vcmask 261120   ;;  %vm272_vm3 = vcmask 7168  }
   0x2   :  { %v324_v4 = vpack.c.bf16 %v13_v2, %v12_v1  ;;  %326 = vmatprep.subr.bf16.mxu1 %v341_v0  ;;  %v15_v6 = vld [vmem:[%s404_s1 + $0x18] sm:$0xff]  ;;  %309 = vmatprep.mubr.msk.f32.mxu1 %vm342_vm0, %v343_v3  ;;  %v11_v8 = vld [vmem:[%s405_s0] sm:$0xff]  ;;  %v17_v10 = vld [vmem:[%s404_s1 + $0x28] sm:$0xff] }
   0x3   :  { %v327_v7 = vpack.c.bf16 %v15_v6, %v14_v5  ;;  %v16_v9 = vld [vmem:[%s404_s1 + $0x20] sm:$0xff]  ;;  %v18_v12 = vld [vmem:[%s404_s1 + $0x30] sm:$0xff]  ;;  %v19_v13 = vld [vmem:[%s404_s1 + $0x38] sm:$0xff]  ;;  %v24_v16 = vshrl.u32 %v23_v15, 7 }
   0x4   :  { %325 = vmatpush3.bf16.msra.mxu0 %v324_v4  ;;  %v330_v11 = vpack.c.bf16 %v17_v10, %v16_v9  ;;  %v333_v14 = vpack.c.bf16 %v19_v13, %v18_v12  ;;  %v22_v18 = vld [vmem:[%s404_s1 + $0x50] sm:$0xff]  ;;  %v20_v24 = vld [vmem:[%s404_s1 + $0x40] sm:$0xff]  ;;  %v21_v25 = vld [vmem:[%s404_s1 + $0x48] sm:$0xff] }
   0x5   :  { %328 = vmatpush3.bf16.msra.mxu1 %v327_v7  ;;  %332 = vmatprep.subr.bf16.mxu0 %v341_v0  ;;  %v25_v17 = vsub.s32 0, %v24_v16  ;;  %v336_v26 = vpack.c.bf16 %v21_v25, %v20_v24  ;;  %v104_v27 = vsub.s32 1, %v24_v16  ;;  %v183_v33 = vsub.s32 2, %v24_v16 }
   0x6   :  { %329 = vmatprep.subr.bf16.mxu1 %v341_v0  ;;  %v261_v35 = vsub.s32 3, %v24_v16  ;;  %v269_v43 = vsub.s32 4, %v24_v16 }
   0x7   :  { %299 = vmatmul.mubr.msk.f32.vlgmr.msra.gmra.mrb[0].mxu0 %vm27_vm1, %v11_v8  ;;  %v26_v19 = vrot.slane %v22_v18, %v25_v17  ;;  %v105_v28 = vrot.slane %v22_v18, %v104_v27  ;;  %v184_v34 = vrot.slane %v22_v18, %v183_v33 }
   0x8   :  { %320 = vmatprep.mubr.msk.f32.mxu0 %vm342_vm0, %v343_v3  ;;  %334 = vmatpush3.bf16.msra.mxu0 %v333_v14  ;;  %v262_v39 = vrot.slane %v22_v18, %v261_v35  ;;  %v270_v44 = vrot.slane %v22_v18, %v269_v43 }
   0x9   :  { %331 = vmatpush3.bf16.msra.mxu1 %v330_v11  ;;  %335 = vmatprep.subr.bf16.mxu0 %v341_v0 }
   0xc   :  { %337 = vmatpush3.bf16.msra.mxu0 %v336_v26 }
  0xda   :  { %v97_v20 = vpop.f32.mrb[0].mxu0 }
  0xdb   :  { %v98_v21 = vadd.f32 %v97_v20, %v26_v19  ;;  %v300_v22 = vpop.f32.mrb[1].mxu0 }
  0xdd   :  { %v101_v23 = vmax.f32 %v98_v21, 0.0 }
  0xdf   :  { %310 = vmatmul.mubr.msk.f32.vlgmr.msra.gmra.mrb[0].mxu1 %vm106_vm2, %v101_v23 }
 0x1b2   :  { %v176_v29 = vpop.f32.mrb[0].mxu1 }
 0x1b3   :  { %v177_v30 = vadd.f32 %v176_v29, %v105_v28  ;;  %v311_v31 = vpop.f32.mrb[1].mxu1 }
 0x1b5   :  { %v180_v32 = vmax.f32 %v177_v30, 0.0 }
 0x1b7   :  { %321 = vmatmul.mubr.msk.f32.vlgmr.msra.gmra.mrb[2].mxu0 %vm106_vm2, %v180_v32 }
 0x28a   :  { %v254_v36 = vpop.f32.mrb[2].mxu0 }
 0x28b   :  { %v255_v37 = vadd.f32 %v254_v36, %v184_v34  ;;  %v322_v38 = vpop.f32.mrb[3].mxu0 }
 0x28d   :  { %v258_v40 = vmax.f32 %v255_v37, 0.0 }
 0x28f   :  { %v263_v41 = vmul.f32 %v262_v39, %v258_v40 }
 0x291   :  { %v264_v42 = vsel %vm106_vm2, %v263_v41, 0.0 }
 0x292   :  { %265 = vadd.xlane.f32.xlu0 %v264_v42 }
 0x31f   :  { %v266_v45 = vpop.xlane.xlu0 %265 }
 0x320   :  { %v271_v46 = vadd.f32 %v270_v44, %v266_v45 }
 0x322   :  { %273 = vst.msk [vmem:[%s406_s2] sm:$0xff] %vm272_vm3, %v271_v46 }

</bundles_post_ra>
